<compile_context>
chip_gen: v6e
topology: v6e:2x2x1
jax: 0.10.0
libtpu: 0.0.40
codegen_flags: <defaults>
</compile_context>

<pallas_src>
import jax
import jax.numpy as jnp
from jax.experimental import pallas as pl
from jax.experimental.pallas import tpu as pltpu


def _svd_lora_kernel_f32out(x_ref, w_ref, xu_ref, vt_ref, o_ref):
    """Grid step when the output is f32: accumulate directly into o_ref.

    o_ref's block index ignores k, so it stays resident across the reduction.
    """
    k = pl.program_id(2)

    @pl.when(k == 0)
    def _():
        o_ref[...] = jnp.zeros_like(o_ref)

    o_ref[...] += jnp.dot(x_ref[...], w_ref[...],
                          preferred_element_type=jnp.float32)

    @pl.when(k == pl.num_programs(2) - 1)
    def _():
        # Hoisted low-rank contribution: once per output tile.
        o_ref[...] += jnp.dot(xu_ref[...], vt_ref[...],
                              preferred_element_type=jnp.float32)


def _svd_lora_kernel_acc(x_ref, w_ref, xu_ref, vt_ref, o_ref, acc_ref):
    """Grid step for non-f32 outputs: f32 VMEM accumulator + final cast."""
    k = pl.program_id(2)

    @pl.when(k == 0)
    def _():
        acc_ref[...] = jnp.zeros_like(acc_ref)

    acc_ref[...] += jnp.dot(x_ref[...], w_ref[...],
                            preferred_element_type=jnp.float32)

    @pl.when(k == pl.num_programs(2) - 1)
    def _():
        lowrank = jnp.dot(xu_ref[...], vt_ref[...],
                          preferred_element_type=jnp.float32)
        o_ref[...] = (acc_ref[...] + lowrank).astype(o_ref.dtype)


def _pick_tile(dim, target, align):
    """Largest tile <= target that divides `dim` and is a multiple of `align`.

    If dim <= target, return the full dim (BlockSpec "equals the full array
    dim" escape from the (8, 128) rule).
    """
    if dim <= target:
        return dim
    top = (target // align) * align
    for cand in range(top, 0, -align):
        if dim % cand == 0:
            return cand
    # TODO(synk): pad + mask the tail tile instead of a full-dim fallback for
    # large non-divisible dims (potential VMEM hazard on v7x's 64 MiB).
    return dim


def svd_lora_forward(x, orig_weight, lora_u, lora_s, lora_vt, *,
                     tm=512, tn=512, tk=512, compute_dtype=None):
    """x: (..., IN); returns (..., OUT) == x @ (W + U diag(s) Vt)."""
    in_features, out_features = orig_weight.shape
    lead = x.shape[:-1]
    x2d = x.reshape(-1, in_features)
    m = x2d.shape[0]
    out_dtype = x.dtype
    cdt = jnp.dtype(compute_dtype) if compute_dtype is not None else jnp.dtype(x.dtype)

    # Fold diag(lora_s) into lora_u once (static weights).
    u_scaled = lora_u.astype(jnp.float32) * lora_s.astype(jnp.float32)[None, :]

    # Pad rank to a sublane multiple; zero rows/cols contribute exactly 0.
    r = lora_s.shape[0]
    r_pad = (-r) % 8
    vt = lora_vt
    if r_pad:
        u_scaled = jnp.pad(u_scaled, ((0, 0), (0, r_pad)))
        vt = jnp.pad(vt, ((0, r_pad), (0, 0)))
    rp = r + r_pad

    x_c = x2d.astype(cdt)
    w_c = orig_weight.astype(cdt)
    vt_c = vt.astype(cdt)

    # Hoist x @ (U*s) out of the kernel's (j, k) loops entirely: a tiny
    # O(M*IN*R) XLA matmul with f32 accumulation, then a single cast to the
    # compute dtype (one extra rounding vs. PyTorch when compute_dtype=bf16).
    xu = jnp.dot(x_c, u_scaled.astype(cdt),
                 preferred_element_type=jnp.float32).astype(cdt)

    # Tile selection: bm is a sublane (8) multiple, bn/bk are lane (128)
    # multiples (or the full dim for small shapes).
    bm = _pick_tile(m, tm, 8)
    bn = _pick_tile(out_features, tn, 128)
    bk = _pick_tile(in_features, tk, 128)

    # v7x has 2 TensorCores: make sure the parallel (M, N) grid has >= 2 tiles
    # when the problem can be split cleanly.
    if (m // bm) * (out_features // bn) == 1:
        if bm % 16 == 0 and bm >= 16:
            bm //= 2
        elif bn % 256 == 0 and bn >= 256:
            bn //= 2

    grid = (m // bm, out_features // bn, in_features // bk)
    grid_m, grid_n, grid_k = grid

    isz_c = cdt.itemsize
    isz_o = jnp.dtype(out_dtype).itemsize
    use_scratch = jnp.dtype(out_dtype) != jnp.dtype(jnp.float32)

    # Double-buffered working set + optional scratch, with 2x headroom,
    # clamped to [32 MiB, 64 MiB] (64 MiB == v7x physical VMEM per TC).
    tile_bytes = (bm * bk + bk * bn + bm * rp + rp * bn) * isz_c + bm * bn * isz_o
    need = 2 * tile_bytes + (bm * bn * 4 if use_scratch else 0)
    vmem_limit = int(min(64 << 20, max(32 << 20, 2 * need)))

    # Tiled-traffic cost hint: x is re-read once per N tile, W and Vt once per
    # M tile, xu once total, output written once.
    cost = pl.CostEstimate(
        flops=2 * m * in_features * out_features + 2 * m * rp * out_features,
        transcendentals=0,
        bytes_accessed=(grid_n * m * in_features * isz_c
                        + grid_m * in_features * out_features * isz_c
                        + m * rp * isz_c
                        + grid_m * rp * out_features * isz_c
                        + m * out_features * isz_o),
    )

    kernel = _svd_lora_kernel_acc if use_scratch else _svd_lora_kernel_f32out
    scratch = [pltpu.VMEM((bm, bn), jnp.float32)] if use_scratch else []

    out2d = pl.pallas_call(
        kernel,
        out_shape=jax.ShapeDtypeStruct((m, out_features), out_dtype),
        grid_spec=pltpu.PrefetchScalarGridSpec(
            num_scalar_prefetch=0,
            grid=grid,
            in_specs=[
                pl.BlockSpec((bm, bk), lambda i, j, k: (i, k)),   # x
                pl.BlockSpec((bk, bn), lambda i, j, k: (k, j)),   # orig_weight
                pl.BlockSpec((bm, rp), lambda i, j, k: (i, 0)),   # xu (hoisted)
                pl.BlockSpec((rp, bn), lambda i, j, k: (0, j)),   # Vt
            ],
            out_specs=pl.BlockSpec((bm, bn), lambda i, j, k: (i, j)),
            scratch_shapes=scratch,
        ),
        compiler_params=pltpu.CompilerParams(
            dimension_semantics=("parallel", "parallel", "arbitrary"),
            vmem_limit_bytes=vmem_limit,
        ),
        cost_estimate=cost,
    )(x_c, w_c, xu, vt_c)

    return out2d.reshape(*lead, out_features)


def calc_extra_loss(u, vt, lora_u, lora_vt, rank, cur_idx, k):
    # Side-effect orthogonality metric of the PyTorch module (not part of the
    # forward output). Tiny gram matrices + Frobenius norms -> plain JAX.
    # TODO(synk): verify nested-adapter concat semantics for cur_idx > 0.
    u_cat = jnp.concatenate([u[:, : -rank * (cur_idx + 1)], lora_u], axis=1)
    vt_cat = jnp.concatenate([vt[: -rank * (cur_idx + 1), :], lora_vt], axis=0)
    eye = jnp.eye(k, dtype=u.dtype)
    u_norm = jnp.linalg.norm(u_cat.T @ u_cat - eye)
    vt_norm = jnp.linalg.norm(vt_cat @ vt_cat.T - eye)
    return u_norm + vt_norm


if __name__ == "__main__":
    # ------------------------------------------------------------------
    # Test 1: module-consistent construction (SVD init, update_adapter(0)),
    # small shapes -> small single-K-block path (with the megacore M split).
    # ------------------------------------------------------------------
    batch, seq = 2, 8
    in_features, out_features = 32, 32
    rank, n_adapters = 4, 3
    enable_extra_loss = True

    key = jax.random.PRNGKey(0)
    k_w, k_x, k_w2, k_x2, k_u2, k_s2, k_v2 = jax.random.split(key, 7)

    # Deterministic synthetic "orig_module.weight" (out_features, in_features).
    weight = jax.random.normal(k_w, (out_features, in_features), jnp.float32) * 0.05

    # SVD of weight.T, as in the module __init__.
    u, s, vt = jnp.linalg.svd(weight.T, full_matrices=False)  # (IN,K),(K,),(K,OUT)
    k = s.shape[0]
    full_w = u @ jnp.diag(s) @ vt                              # (IN, OUT)

    # update_adapter(0): lora = last `rank` singular triplets; subtract from orig.
    cur_idx = 0
    start = -rank * (cur_idx + 1)
    lora_u = u[:, start:]                                      # (IN, R)
    lora_s = s[start:]                                         # (R,)
    lora_vt = vt[start:, :]                                    # (R, OUT)
    orig_weight = full_w - lora_u @ jnp.diag(lora_s) @ lora_vt

    x = jax.random.normal(k_x, (batch, seq, in_features), jnp.float32)

    out = svd_lora_forward(x, orig_weight, lora_u, lora_s, lora_vt)
    out = jax.block_until_ready(out)

    ref = x @ (orig_weight + lora_u @ jnp.diag(lora_s) @ lora_vt)
    assert out.shape == (batch, seq, out_features)
    assert jnp.allclose(out, ref, atol=1e-4, rtol=1e-4), "test1 mismatch"

    if enable_extra_loss:
        extra_loss = jax.block_until_ready(
            calc_extra_loss(u, vt, lora_u, lora_vt, rank, cur_idx, k)
        )  # stored as a side-effect in the PyTorch module, not returned.

    # ------------------------------------------------------------------
    # Test 2: exercises the real tiled grid (2x2x2 grid: K accumulation,
    # multiple M/N tiles, hoisted low-rank applied once per output tile).
    # ------------------------------------------------------------------
    b2, s2_, in2, out2, r2 = 2, 128, 256, 512, 8
    w2 = jax.random.normal(k_w2, (in2, out2), jnp.float32) * 0.02
    lu2 = jax.random.normal(k_u2, (in2, r2), jnp.float32) * 0.1
    ls2 = jax.random.normal(k_s2, (r2,), jnp.float32)
    lvt2 = jax.random.normal(k_v2, (r2, out2), jnp.float32) * 0.1
    x2 = jax.random.normal(k_x2, (b2, s2_, in2), jnp.float32)

    out_big = svd_lora_forward(x2, w2, lu2, ls2, lvt2, tm=128, tn=256, tk=128)
    out_big = jax.block_until_ready(out_big)
    ref_big = x2 @ (w2 + lu2 @ jnp.diag(ls2) @ lvt2)
    assert out_big.shape == (b2, s2_, out2)
    assert jnp.allclose(out_big, ref_big, atol=1e-3, rtol=1e-3), "test2 mismatch"

    # ------------------------------------------------------------------
    # Test 3: bf16 compute dtype (MXU-native on v5e/v6e/v7x), f32 accumulation
    # and f32 output; looser tolerance for operand quantization.
    # ------------------------------------------------------------------
    out_bf16 = svd_lora_forward(x2, w2, lu2, ls2, lvt2,
                                tm=128, tn=256, tk=128,
                                compute_dtype=jnp.bfloat16)
    out_bf16 = jax.block_until_ready(out_bf16)
    assert out_bf16.shape == (b2, s2_, out2)
    assert jnp.allclose(out_bf16, ref_big, atol=5e-2, rtol=5e-2), "test3 mismatch"

    print("KERNEL_OK")
</pallas_src>

<mosaic_0001>
module attributes {stable_mosaic.version = 11 : i64} {
  func.func @_svd_lora_kernel_f32out(%arg0: i32, %arg1: i32, %arg2: i32, %arg3: memref<8x32xf32, #tpu.memory_space<vmem>>, %arg4: memref<32x32xf32, #tpu.memory_space<vmem>>, %arg5: memref<8x8xf32, #tpu.memory_space<vmem>>, %arg6: memref<8x32xf32, #tpu.memory_space<vmem>>, %arg7: memref<8x32xf32, #tpu.memory_space<vmem>>) attributes {dimension_semantics = [#tpu.dimension_semantics<parallel>, #tpu.dimension_semantics<parallel>, #tpu.dimension_semantics<arbitrary>], iteration_bounds = array<i64: 2, 1, 1>, scalar_prefetch = 0 : i64, scratch_operands = 0 : i64, tpu.core_type = #tpu.core_type<tc>, window_params = [{transform_indices = @transform_0, window_bounds = array<i64: 8, 32>}, {transform_indices = @transform_1, window_bounds = array<i64: 32, 32>}, {transform_indices = @transform_2, window_bounds = array<i64: 8, 8>}, {transform_indices = @transform_3, window_bounds = array<i64: 8, 32>}, {transform_indices = @transform_4, window_bounds = array<i64: 8, 32>}]} {
    %c0_i32 = arith.constant 0 : i32
    %0 = arith.cmpi eq, %arg2, %c0_i32 : i32
    %1 = arith.extui %0 : i1 to i32
    %c0_i32_0 = arith.constant 0 : i32
    %2 = arith.cmpi ne, %1, %c0_i32_0 : i32
    scf.if %2 {
      %cst_10 = arith.constant 0.000000e+00 : f32
      %12 = vector.broadcast %cst_10 : f32 to vector<8x32xf32>
      %c0_11 = arith.constant 0 : index
      %c0_12 = arith.constant 0 : index
      %13 = vector.load %arg7[%c0_11, %c0_12] : memref<8x32xf32, #tpu.memory_space<vmem>>, vector<8x32xf32>
      tpu.vector_store %arg7[%c0_11, %c0_12], %12 {strides = array<i32>} : memref<8x32xf32, #tpu.memory_space<vmem>>, vector<8x32xf32>,
    } else {
    }
    %c0 = arith.constant 0 : index
    %c0_1 = arith.constant 0 : index
    %3 = vector.load %arg7[%c0, %c0_1] : memref<8x32xf32, #tpu.memory_space<vmem>>, vector<8x32xf32>
    %c0_2 = arith.constant 0 : index
    %c0_3 = arith.constant 0 : index
    %4 = vector.load %arg3[%c0_2, %c0_3] : memref<8x32xf32, #tpu.memory_space<vmem>>, vector<8x32xf32>
    %c0_4 = arith.constant 0 : index
    %c0_5 = arith.constant 0 : index
    %5 = vector.load %arg4[%c0_4, %c0_5] : memref<32x32xf32, #tpu.memory_space<vmem>>, vector<32x32xf32>
    %cst = arith.constant dense<0.000000e+00> : vector<8x32xf32>
    %6 = tpu.matmul %4, %5, %cst {dimension_numbers = #tpu.dot_dimension_numbers<[1], [0], [0], [1], [0, 0, 1, 1], [], []>} : vector<8x32xf32>, vector<32x32xf32>, vector<8x32xf32> -> vector<8x32xf32>
    %7 = arith.addf %3, %6 : vector<8x32xf32>
    %c0_6 = arith.constant 0 : index
    %c0_7 = arith.constant 0 : index
    %8 = vector.load %arg7[%c0_6, %c0_7] : memref<8x32xf32, #tpu.memory_space<vmem>>, vector<8x32xf32>
    tpu.vector_store %arg7[%c0_6, %c0_7], %7 {strides = array<i32>} : memref<8x32xf32, #tpu.memory_space<vmem>>, vector<8x32xf32>,
    %c0_i32_8 = arith.constant 0 : i32
    %9 = arith.cmpi eq, %arg2, %c0_i32_8 : i32
    %10 = arith.extui %9 : i1 to i32
    %c0_i32_9 = arith.constant 0 : i32
    %11 = arith.cmpi ne, %10, %c0_i32_9 : i32
    scf.if %11 {
      %c0_10 = arith.constant 0 : index
      %c0_11 = arith.constant 0 : index
      %12 = vector.load %arg7[%c0_10, %c0_11] : memref<8x32xf32, #tpu.memory_space<vmem>>, vector<8x32xf32>
      %c0_12 = arith.constant 0 : index
      %c0_13 = arith.constant 0 : index
      %13 = vector.load %arg5[%c0_12, %c0_13] : memref<8x8xf32, #tpu.memory_space<vmem>>, vector<8x8xf32>
      %c0_14 = arith.constant 0 : index
      %c0_15 = arith.constant 0 : index
      %14 = vector.load %arg6[%c0_14, %c0_15] : memref<8x32xf32, #tpu.memory_space<vmem>>, vector<8x32xf32>
      %cst_16 = arith.constant dense<0.000000e+00> : vector<8x32xf32>
      %15 = tpu.matmul %13, %14, %cst_16 {dimension_numbers = #tpu.dot_dimension_numbers<[1], [0], [0], [1], [0, 0, 1, 1], [], []>} : vector<8x8xf32>, vector<8x32xf32>, vector<8x32xf32> -> vector<8x32xf32>
      %16 = arith.addf %12, %15 : vector<8x32xf32>
      %c0_17 = arith.constant 0 : index
      %c0_18 = arith.constant 0 : index
      %17 = vector.load %arg7[%c0_17, %c0_18] : memref<8x32xf32, #tpu.memory_space<vmem>>, vector<8x32xf32>
      tpu.vector_store %arg7[%c0_17, %c0_18], %16 {strides = array<i32>} : memref<8x32xf32, #tpu.memory_space<vmem>>, vector<8x32xf32>,
    } else {
    }
    return
  }
  func.func @transform_0(%arg0: i32, %arg1: i32, %arg2: i32) -> (i32, i32) {
    %c0_i32 = arith.constant 0 : i32
    return %arg0, %arg2 : i32, i32
  }
  func.func @transform_1(%arg0: i32, %arg1: i32, %arg2: i32) -> (i32, i32) {
    %c0_i32 = arith.constant 0 : i32
    return %arg2, %arg1 : i32, i32
  }
  func.func @transform_2(%arg0: i32, %arg1: i32, %arg2: i32) -> (i32, i32) {
    %c0_i32 = arith.constant 0 : i32
    %c0_i32_0 = arith.constant 0 : i32
    return %arg0, %c0_i32 : i32, i32
  }
  func.func @transform_3(%arg0: i32, %arg1: i32, %arg2: i32) -> (i32, i32) {
    %c0_i32 = arith.constant 0 : i32
    %c0_i32_0 = arith.constant 0 : i32
    return %c0_i32, %arg1 : i32, i32
  }
  func.func @transform_4(%arg0: i32, %arg1: i32, %arg2: i32) -> (i32, i32) {
    %c0_i32 = arith.constant 0 : i32
    return %arg0, %arg1 : i32, i32
  }
}

</mosaic_0001>

<bundles_post_ra>
// kernel: tpu_custom_call.1
= control target key start
LH: loop header
LB: loop body
LE: loop exit
PB: predicated region body
PF: predicated region fallthrough
CT: control target
= control target key end

     0   :  { %9 = vsyncpa [#allocation3], 0  ;;  %s979_s0 = inlined_call_operand.vmem [shape: f32[16,32], index: 0, kind: input, shape index: {}]   ;;  %s980_s1 = inlined_call_operand.hbm [shape: f32[32,32], index: 1, kind: input, shape index: {}]   ;;  %s981_s2 = inlined_call_operand.vmem [shape: f32[16,8], index: 2, kind: input, shape index: {}]   ;;  %s982_s3 = inlined_call_operand.vmem [shape: f32[8,32], index: 3, kind: input, shape index: {}]   ;;  %s983_s4 = inlined_call_operand.hbm [shape: f32[16,32], index: 4, kind: output, shape index: {}]  }
   0x1   :  { %10 = vsyncpa [#allocation4], 0 }
   0x2   :  { %12 = vsyncpa [#allocation4 + $0x1], 0  ;;  %s837_s15 = smov 0   ;;  %s839_s16 = smov 0  }
   0x3   :  { %s841_s17 = smov 0   ;;  %s843_s18 = smov 0  }
   0x4   :  { %s845_s19 = smov 0   ;;  %s847_s20 = smov 0  }
   0x5 LB: > { %s588_s21 = sadd.s32 4294967295, %s804_s20   ;;  %s589_s22 = sadd.s32 4294967294, %s804_s20   ;;  %s804_s20 = sphi %s847_s20, %s18_s20   ;;  %s800_s19 = sphi %s845_s19, %s992_s19   ;;  %s796_s18 = sphi %s843_s18, %s991_s18   ;;  %s792_s17 = sphi %s841_s17, %s990_s17   ;;  %s788_s16 = sphi %s839_s16, %s989_s16   ;;  %s784_s15 = sphi %s837_s15, %s988_s15  }
   0x6   : > { %s37_s23 = sadd.s32 1, %s800_s19  ;;  %s154_s24 = sadd.s32 1, %s792_s17 }
   0x7   : > { %p39_p0 = scmp.ge.s32.totalorder %s37_s23, 2  ;;  %p164_p1 = scmp.ne.s32.totalorder %s792_s17, %s788_s16 }
   0x8   : > { %p165_p2 = scmp.eq.s32.totalorder %s588_s21, 1  ;;  %p170_p3 = scmp.ne.s32.totalorder %s788_s16, %s784_s15 }
   0x9   : > { %s994_s23 = smov (%p39_p0, %s37_s23), 0  ;;  %p171_p5 = scmp.eq.s32.totalorder %s589_s22, 1 }
   0xa   : > { %p877_p4 = por %p165_p2, %p164_p1  ;;  %s149_s26 = ssub.s32 %s800_s19, %s994_s23 }
   0xb   : > { %p590_p6 = scmp.ge.s32.totalorder %s804_s20, 1  ;;  %p152_p7 = scmp.eq.s32.totalorder %s149_s26, 0 }
   0xc   : > { %p884_p8 = por %p171_p5, %p170_p3  ;;  %p178_p9 = scmp.lt.s32.totalorder %s804_s20, 3 }
   0xd   : > { %s890_s28 = scalar_select %p152_p7, %s792_s17, %s154_s24  }
   0xe   : > { %p892_p10 = pnand %p590_p6, %p178_p9  ;;  %p896_p11 = scmp.eq.s32.totalorder %s588_s21, 0 }
   0xf   : > { %s806_s5 = smov [#allocation2]  }
  0x10   : > { %p634_p12 = pneg %p892_p10  ;;  %s194_s6 = sshll.u32 %s806_s5, 4  ;;  %s195_s6 = int_to_ptr.vmem [resolvable:$true] %s194_s6 }
  0x11   : > { %s709_s7 = scalar_lea.vmem %s195_s6, 512  ;;  %p717_p5 = scmp.lt.s32.totalorder %s195_s6, %s195_s6 }
  0x12   : > { %p635_p13 = pnand %p896_p11, %p634_p12  ;;  %p710_p1 = scmp.ne.s32.totalorder %s195_s6, %s709_s7 }
  0x13   : > { %p718_p6 = scmp.lt.s32.totalorder %s709_s7, %s709_s7 }
  0x14   : > { %p700_p0 = pneg %p635_p13 }
  0x15   : > { %p719_p7 = por %p718_p6, %p717_p5 }
  0x16   : > { %p712_p2 = pnand %p710_p1, %p700_p0 }
  0x18   : > { %p713_p3 = pneg %p712_p2 }
  0x1a   : > { %p720_p9 = pnand %p719_p7, %p713_p3 }
  0x1c   : > { %723 = shalt.err (!%p720_p9)
}
  0x1d   : > { %s807_s8 = smov 128   ;;  %s808_s9 = smov 8  }
  0x1e   : > { %637 = dma.hbm_to_vmem [thread:$0]  (!%p635_p13), %s980_s1, 512, %s195_s6, [#allocation3], %s807_s8, %s807_s8, %s808_s9  }
  0x1f   : > { %234 = sbr.rel (%p892_p10) target bundleno = 265 (0x109), region = 36 }
  0x24   : > { %775 = dma.done.wait (%p896_p11), [#allocation3], 512  }
  0x25   : > { %777 = vsyncadd (%p896_p11), [#allocation3], 4294966784  ;;  %p270_p12 = scmp.lt.s32.totalorder %s796_s18, 1  ;;  %v809_v0 = vmov 0.0   ;;  %vm810_vm0 = vmmov 0   ;;  %s267_s12 = sand.u32 1, %s788_s16  }
  0x26   : > { %612 = vmatprep.subr.mxu0 %v809_v0  ;;  %620 = vmatprep.mubr.msk.f32.mxu0 %vm810_vm0, %v809_v0  ;;  %s596_s14 = sshll.u32 %s267_s12, 3  ;;  %vm290_vm1 = vcmask 261120   ;;  %v297_v1 = vld [vmem:[#allocation2 + $0x18] sm:$0xff]  ;;  %v296_v2 = vld [vmem:[#allocation2 + $0x10] sm:$0xff]  ;;  %vm380_vm2 = vcmask 64512   ;;  %v379_v3 = vld [vmem:[%s982_s3] sm:$0xff] }
  0x27   : > { %s271_s13 = scalar_select %p270_p12, %s796_s18, 1  ;;  %623 = vmatprep.subr.mxu1 %v809_v0  ;;  %625 = vmatprep.mubr.msk.f32.mxu1 %vm810_vm0, %v809_v0  ;;  %v295_v4 = vld [vmem:[#allocation2 + $0x8] sm:$0xff]  ;;  %v294_v6 = vld [vmem:[#allocation2] sm:$0xff] }
  0x28   : > { %s918_s22 = scalar_lea.vmem [#allocation5], %s596_s14  ;;  %613 = vmatpush3.msra.mxu0 %v297_v1  ;;  %624 = vmatpush3.msra.mxu1 %v379_v3  ;;  %s602_s9 = sshll.u32 %s796_s18, 7 }
  0x29   : > { %s597_s21 = sshll.u32 %s271_s13, 3  ;;  %291 = vst.msk [vmem:[%s918_s22] sm:$0xff] %vm290_vm1, %v809_v0  ;;  %614 = vmatprep.subr.mxu0 %v809_v0  ;;  %s471_s10 = sshll.u32 %s918_s22, 4  ;;  %s472_s10 = int_to_ptr.vmem [resolvable:$true] %s471_s10 }
  0x2a   : > { %s281_s29 = scalar_lea.vmem %s981_s2, %s597_s21  ;;  %s276_s8 = scalar_lea.vmem %s979_s0, %s597_s21  ;;  %615 = vmatpush3.msra.mxu0 %v296_v2 }
  0x2b   : > { %v378_v5 = vld [vmem:[%s281_s29] sm:$0xff]  ;;  %616 = vmatprep.subr.mxu0 %v809_v0  ;;  %s469_s14 = scalar_lea.hbm %s983_s4, %s602_s9  ;;  %s457_s21 = scalar_lea.sflag [#allocation4], %s267_s12 }
  0x2c   : > { %626 = vmatmul.mubr.msk.f32.vlgmr.msra.gmra.mxu1 %vm380_vm2, %v378_v5  ;;  %617 = vmatpush3.msra.mxu0 %v295_v4  ;;  %v293_v7 = vld [vmem:[%s276_s8] sm:$0xff]  ;;  %s724_s24 = scalar_lea.vmem %s472_s10, 128  ;;  %s811_s26 = smov [#allocation5]  }
  0x2d   : > { %618 = vmatprep.subr.mxu0 %v809_v0  ;;  %p725_p10 = scmp.ne.s32.totalorder %s472_s10, %s724_s24  ;;  %s728_s29 = sshll.u32 %s811_s26, 4  ;;  %s729_s29 = int_to_ptr.vmem [resolvable:$false] %s728_s29 }
  0x2e   : > { %619 = vmatpush3.msra.mxu0 %v294_v6  ;;  %s730_s18 = scalar_lea.vmem %s729_s29, 256  ;;  %p731_p0 = scmp.lt.s32.totalorder %s472_s10, %s729_s29 }
  0x2f   : > { %621 = vmatmul.mubr.msk.f32.vlgmr.msra.gmra.mxu0 %vm290_vm1, %v293_v7  ;;  %p726_p11 = pnand %p725_p10, %p877_p4  ;;  %p732_p1 = scmp.lt.s32.totalorder %s730_s18, %s724_s24 }
  0x30   : > { %v292_v10 = vld [vmem:[%s918_s22] sm:$0xff] }
  0x31   : > { %p727_p13 = pneg %p726_p11  ;;  %p733_p2 = por %p732_p1, %p731_p0 }
  0x33   : > { %p734_p3 = pnand %p733_p2, %p727_p13 }
  0xec   : > { %v450_v8 = vpop.f32.mrf.mxu1 }
  0xee   : > { %v627_v9 = vpop.f32.mrf.mxu1 }
  0xef   : > { %v368_v11 = vpop.f32.mrf.mxu0 }
  0xf0   : > { %v372_v12 = vadd.f32 %v368_v11, %v292_v10 }
  0xf1   : > { %v622_v13 = vpop.f32.mrf.mxu0 }
  0xf2   : > { %373 = vst.msk [vmem:[%s918_s22] sm:$0xff] %vm290_vm1, %v372_v12 }
  0xf9   : > { %v377_v14 = vld [vmem:[%s918_s22] sm:$0xff] }
  0xfa   : > { %v454_v15 = vadd.f32 %v450_v8, %v377_v14 }
  0xfc   : > { %455 = vst.msk [vmem:[%s918_s22] sm:$0xff] %vm290_vm1, %v454_v15 }
  0xfd   : > { %737 = shalt.err (!%p734_p3)
}
  0xfe   : > { %s738_s30 = scalar_lea.hbm %s469_s14, 128  ;;  %s742_s5 = scalar_lea.hbm %s983_s4, 256 }
  0xff   : > { %p739_p5 = scmp.ne.s32.totalorder %s469_s14, %s738_s30  ;;  %p743_p9 = scmp.lt.s32.totalorder %s469_s14, %s983_s4 }
 0x100   : > { %p744_p12 = scmp.lt.s32.totalorder %s742_s5, %s738_s30 }
 0x101   : > { %p740_p6 = pnand %p739_p5, %p877_p4 }
 0x102   : > { %p745_p10 = por %p744_p12, %p743_p9 }
 0x103   : > { %p741_p7 = pneg %p740_p6 }
 0x105   : > { %p746_p11 = pnand %p745_p10, %p741_p7 }
 0x107   : > { %749 = shalt.err (!%p746_p11)
}
 0x108   : > { %632 = dma.vmem_to_hbm [thread:$0]  (%p877_p4), %s472_s10, 128, %s469_s14, %s457_s21  }
 0x109 PF: > { %p644_p13 = scmp.ge.s32.totalorder %s804_s20, 2  ;;  %s483_s8 = sand.u32 1, %s784_s15  }
 0x10a   : > { %s484_s9 = scalar_lea.sflag [#allocation4], %s483_s8 }
 0x10b   : > { %p639_p0 = pnand %p644_p13, %p884_p8 }
 0x10d   : > { %p640_p1 = pneg %p639_p0 }
 0x10f   : > { %779 = dma.done.wait (%p640_p1), %s484_s9, 128  }
 0x110   : > { %781 = vsyncadd (%p640_p1), %s484_s9, 4294967168  ;;  %s18_s20 = sadd.s32 1, %s804_s20   ;;  %s988_s15 = smov %s788_s16 }
 0x111   : > { %p15_p2 = scmp.ge.s32.totalorder %s18_s20, 4   ;;  %s989_s16 = smov %s792_s17 }
 0x112   : > { %s990_s17 = smov %s890_s28  ;;  %s991_s18 = smov %s800_s19 }
 0x113   : > { %s992_s19 = smov %s994_s23  ;;  %17 = sbr.rel (!%p15_p2) target bundleno = 5 (0x5), region = 91 }
 0x118   :  { %489 = vsyncpa [#allocation3], 1 }
 0x119   :  { %491 = vsyncpa [#allocation3 + $0x1], 1 }
 0x11a   :  { %492 = vsyncpa [#allocation4], 1 }
 0x11b   :  { %494 = vsyncpa [#allocation4 + $0x1], 1 }

</bundles_post_ra>
